<compile_context>
chip_gen: v7x
topology: tpu7x:2x2x1
jax: 0.10.0
libtpu: 0.0.40
codegen_flags: <defaults>
</compile_context>

<pallas_src>
import math
import functools

import jax
import jax.numpy as jnp
from jax import lax
from jax.experimental import pallas as pl
from jax.experimental.pallas import tpu as pltpu


_NEG_MASK = -1e30  # large finite negative (not -inf) avoids inf-inf NaNs in max-subtraction


def _mha_kernel(x_ref, pin_ref, pout_ref, o_ref, *,
                batch: int, seq_len: int, num_heads: int, head_dim: int):
    """Fused multi-head self-attention, whole problem in one invocation.

    In-kernel shapes:
      x_ref    : (B*L, E)   rows ordered (b, l)
      pin_ref  : (E+1, 3E)  rows 0..E-1 = in_proj_weight^T (q cols pre-scaled by 1/sqrt(Dh)),
                            row E = in_proj_bias (q part pre-scaled)
      pout_ref : (E+1, E)   rows 0..E-1 = out_proj_weight^T, row E = out_proj_bias
      o_ref    : (B*L, E)
    """
    B, L, H, Dh = batch, seq_len, num_heads, head_dim
    E = H * Dh
    BL = B * L
    R = H * BL                                   # stacked attention rows, order (h, b, l)

    x2 = x_ref[...]                              # (BL, E)
    w_in_t = pin_ref[:E, :]                      # (E, 3E)
    b_in = pin_ref[E:E + 1, :]                   # (1, 3E)
    w_out_t = pout_ref[:E, :]                    # (E, E)
    b_out = pout_ref[E:E + 1, :]                 # (1, E)

    # --- fused QKV projection, all batch rows in the M dim: one MXU push ---
    qkv = jnp.dot(x2, w_in_t, preferred_element_type=jnp.float32) + b_in     # (BL, 3E)

    # --- stack (head, batch) along sublanes: lane slices -> (H*BL, Dh), row = h*BL + b*L + l.
    # Keeping each head's rows contiguous makes the later per-head slices cheap sublane slices.
    q_st = jnp.concatenate([qkv[:, h * Dh:(h + 1) * Dh] for h in range(H)], axis=0)
    k_st = jnp.concatenate([qkv[:, E + h * Dh:E + (h + 1) * Dh] for h in range(H)], axis=0)
    v_st = jnp.concatenate([qkv[:, 2 * E + h * Dh:2 * E + (h + 1) * Dh] for h in range(H)], axis=0)

    # --- single block-diagonal-masked attention for all (head, batch) blocks ---
    # scores: contract Dh of both operands (no explicit K transpose) -> (R, R)
    s = lax.dot_general(q_st, k_st, (((1,), (1,)), ((), ())),
                        preferred_element_type=jnp.float32)
    r_idx = lax.broadcasted_iota(jnp.int32, (R, R), 0)
    c_idx = lax.broadcasted_iota(jnp.int32, (R, R), 1)
    if L & (L - 1) == 0:
        # power-of-two L: same length-L block <=> (r ^ c) < L  (pure VPU xor/compare)
        same_block = (r_idx ^ c_idx) < L
    else:
        same_block = (r_idx // L) == (c_idx // L)
    s = jnp.where(same_block, s, _NEG_MASK)
    s = s - jnp.max(s, axis=-1, keepdims=True)
    p = jnp.exp(s)
    p = p / jnp.sum(p, axis=-1, keepdims=True)                 # exact reciprocal (tiny at L=8)
    o_st = jnp.dot(p, v_st, preferred_element_type=jnp.float32)  # (R, Dh)

    # --- output projection as a sum over heads: no lane concatenation anywhere ---
    out = jnp.dot(o_st[0:BL, :], w_out_t[0:Dh, :], preferred_element_type=jnp.float32)
    for h in range(1, H):                       # static H; all slices are sublane slices
        out = out + jnp.dot(o_st[h * BL:(h + 1) * BL, :],
                            w_out_t[h * Dh:(h + 1) * Dh, :],
                            preferred_element_type=jnp.float32)

    o_ref[...] = (out + b_out).astype(o_ref.dtype)             # one full-width store


def pack_mha_params(params, num_heads):
    """One-time, host-side parameter prep:
      * transpose weights to the canonical K-on-sublanes MXU layout,
      * fold the 1/sqrt(Dh) softmax scale into the q projection (weights + bias),
      * pack each weight^T with its bias row into one buffer (5 kernel operands -> 3)."""
    E = params["out_proj_weight"].shape[0]
    assert E % num_heads == 0
    Dh = E // num_heads
    scale = 1.0 / math.sqrt(Dh)

    col_scale = jnp.concatenate([jnp.full((E,), scale, dtype=jnp.float32),
                                 jnp.ones((2 * E,), dtype=jnp.float32)])
    w_in_t = params["in_proj_weight"].T * col_scale                 # (E, 3E)
    b_in = (params["in_proj_bias"] * col_scale).reshape(1, 3 * E)   # (1, 3E)
    p_in = jnp.concatenate([w_in_t, b_in], axis=0)                  # (E+1, 3E)

    w_out_t = params["out_proj_weight"].T                           # (E, E)
    b_out = params["out_proj_bias"].reshape(1, E)                   # (1, E)
    p_out = jnp.concatenate([w_out_t, b_out], axis=0)               # (E+1, E)
    return p_in, p_out


def self_attention_pallas(x_lbe, packed_params, num_heads):
    """x_lbe: (L, B, E) float32, PyTorch MultiheadAttention layout. Returns (L, B, E)."""
    L, B, E = x_lbe.shape
    assert E % num_heads == 0
    head_dim = E // num_heads
    p_in, p_out = packed_params

    # Trivial (few-KiB) wrapper relayout: put batch into the sublane/M dimension.
    x2 = jnp.transpose(x_lbe, (1, 0, 2)).reshape(B * L, E)          # (B*L, E)

    kernel = functools.partial(_mha_kernel, batch=B, seq_len=L,
                               num_heads=num_heads, head_dim=head_dim)
    vmem = pl.BlockSpec(memory_space=pltpu.MemorySpace.VMEM)        # whole array in VMEM

    out2 = pl.pallas_call(
        kernel,
        out_shape=jax.ShapeDtypeStruct((B * L, E), x_lbe.dtype),
        in_specs=[vmem, vmem, vmem],
        out_specs=vmem,
    )(x2, p_in, p_out)

    return jnp.transpose(out2.reshape(B, L, E), (1, 0, 2))          # back to (L, B, E)


def self_attention_ref(x_lbe, params, num_heads):
    """Pure-JAX reference of PyTorch MultiheadAttention forward (eval mode)."""
    L, B, E = x_lbe.shape
    Dh = E // num_heads
    in_w, in_b = params["in_proj_weight"], params["in_proj_bias"]
    wq, wk, wv = in_w[:E], in_w[E:2 * E], in_w[2 * E:]
    bq, bk, bv = in_b[:E], in_b[E:2 * E], in_b[2 * E:]
    wo, bo = params["out_proj_weight"], params["out_proj_bias"]

    with jax.default_matmul_precision("highest"):
        x = jnp.transpose(x_lbe, (1, 0, 2))                         # (B, L, E)
        q = x @ wq.T + bq
        k = x @ wk.T + bk
        v = x @ wv.T + bv

        def split(t):  # (B, L, E) -> (B, H, L, Dh)
            return jnp.transpose(t.reshape(B, L, num_heads, Dh), (0, 2, 1, 3))

        qh, kh, vh = split(q), split(k), split(v)
        s = jnp.einsum("bhld,bhmd->bhlm", qh, kh) / math.sqrt(Dh)
        p = jax.nn.softmax(s, axis=-1)
        o = jnp.einsum("bhlm,bhmd->bhld", p, vh)                    # (B, H, L, Dh)
        o = jnp.transpose(o, (0, 2, 1, 3)).reshape(B, L, E)
        out = o @ wo.T + bo
    return jnp.transpose(out, (1, 0, 2))                            # (L, B, E)


def init_params(key, embed_dim):
    """Deterministic synthetic parameters matching nn.MultiheadAttention's shapes."""
    k1, k2, k3, k4 = jax.random.split(key, 4)
    bound = 1.0 / math.sqrt(embed_dim)
    return {
        "in_proj_weight": jax.random.uniform(k1, (3 * embed_dim, embed_dim),
                                             jnp.float32, -bound, bound),
        "in_proj_bias": jax.random.uniform(k2, (3 * embed_dim,),
                                           jnp.float32, -bound, bound),
        "out_proj_weight": jax.random.uniform(k3, (embed_dim, embed_dim),
                                              jnp.float32, -bound, bound),
        "out_proj_bias": jax.random.uniform(k4, (embed_dim,),
                                            jnp.float32, -bound, bound),
    }


if __name__ == "__main__":
    embed_dim = 32
    num_heads = 4
    seq_len = 8
    batch = 2

    key = jax.random.PRNGKey(0)
    kx, kp = jax.random.split(key)
    x = jax.random.normal(kx, (seq_len, batch, embed_dim), dtype=jnp.float32)  # (L, B, E)
    params = init_params(kp, embed_dim)

    packed = pack_mha_params(params, num_heads)   # one-time parameter prep (outside the hot path)
    out = self_attention_pallas(x, packed, num_heads)
    out = jax.block_until_ready(out)

    ref = self_attention_ref(x, params, num_heads)
    assert out.shape == (seq_len, batch, embed_dim)
    # Exact softmax reciprocal is used; tolerance left at 2e-3 only to cover MXU f32
    # multi-pass vs. XLA reference precision differences (typical error is far smaller).
    assert jnp.allclose(out, ref, atol=2e-3, rtol=2e-3), "mismatch vs reference"

    print("KERNEL_OK")
</pallas_src>

<mosaic_0001>
module attributes {stable_mosaic.version = 11 : i64} {
  func.func @_mha_kernel(%arg0: memref<16x32xf32, #tpu.memory_space<vmem>>, %arg1: memref<33x96xf32, #tpu.memory_space<vmem>>, %arg2: memref<33x32xf32, #tpu.memory_space<vmem>>, %arg3: memref<16x32xf32, #tpu.memory_space<vmem>>) attributes {dimension_semantics = [], scalar_prefetch = 0 : i64, scratch_operands = 0 : i64, tpu.core_type = #tpu.core_type<tc>} {
    %c0 = arith.constant 0 : index
    %c0_0 = arith.constant 0 : index
    %0 = vector.load %arg0[%c0, %c0_0] : memref<16x32xf32, #tpu.memory_space<vmem>>, vector<16x32xf32>
    %c0_1 = arith.constant 0 : index
    %c0_2 = arith.constant 0 : index
    %1 = vector.load %arg1[%c0_1, %c0_2] : memref<33x96xf32, #tpu.memory_space<vmem>>, vector<32x96xf32>
    %c32 = arith.constant 32 : index
    %c0_3 = arith.constant 0 : index
    %2 = vector.load %arg1[%c32, %c0_3] : memref<33x96xf32, #tpu.memory_space<vmem>>, vector<1x96xf32>
    %c0_4 = arith.constant 0 : index
    %c0_5 = arith.constant 0 : index
    %3 = vector.load %arg2[%c0_4, %c0_5] : memref<33x32xf32, #tpu.memory_space<vmem>>, vector<32x32xf32>
    %c32_6 = arith.constant 32 : index
    %c0_7 = arith.constant 0 : index
    %4 = vector.load %arg2[%c32_6, %c0_7] : memref<33x32xf32, #tpu.memory_space<vmem>>, vector<1x32xf32>
    %cst = arith.constant dense<0.000000e+00> : vector<16x96xf32>
    %5 = tpu.matmul %0, %1, %cst {dimension_numbers = #tpu.dot_dimension_numbers<[1], [0], [0], [1], [0, 0, 1, 1], [], []>} : vector<16x32xf32>, vector<32x96xf32>, vector<16x96xf32> -> vector<16x96xf32>
    %6 = vector.broadcast %2 : vector<1x96xf32> to vector<16x96xf32>
    %7 = arith.addf %5, %6 : vector<16x96xf32>
    %8 = vector.extract_strided_slice %7 {offsets = [0, 0], sizes = [16, 8], strides = [1, 1]} : vector<16x96xf32> to vector<16x8xf32>
    %9 = vector.extract_strided_slice %7 {offsets = [0, 8], sizes = [16, 8], strides = [1, 1]} : vector<16x96xf32> to vector<16x8xf32>
    %10 = vector.extract_strided_slice %7 {offsets = [0, 16], sizes = [16, 8], strides = [1, 1]} : vector<16x96xf32> to vector<16x8xf32>
    %11 = vector.extract_strided_slice %7 {offsets = [0, 24], sizes = [16, 8], strides = [1, 1]} : vector<16x96xf32> to vector<16x8xf32>
    %12 = tpu.concatenate %8, %9, %10, %11 in 0 : vector<16x8xf32>, vector<16x8xf32>, vector<16x8xf32>, vector<16x8xf32> -> vector<64x8xf32>
    %13 = vector.extract_strided_slice %7 {offsets = [0, 32], sizes = [16, 8], strides = [1, 1]} : vector<16x96xf32> to vector<16x8xf32>
    %14 = vector.extract_strided_slice %7 {offsets = [0, 40], sizes = [16, 8], strides = [1, 1]} : vector<16x96xf32> to vector<16x8xf32>
    %15 = vector.extract_strided_slice %7 {offsets = [0, 48], sizes = [16, 8], strides = [1, 1]} : vector<16x96xf32> to vector<16x8xf32>
    %16 = vector.extract_strided_slice %7 {offsets = [0, 56], sizes = [16, 8], strides = [1, 1]} : vector<16x96xf32> to vector<16x8xf32>
    %17 = tpu.concatenate %13, %14, %15, %16 in 0 : vector<16x8xf32>, vector<16x8xf32>, vector<16x8xf32>, vector<16x8xf32> -> vector<64x8xf32>
    %18 = vector.extract_strided_slice %7 {offsets = [0, 64], sizes = [16, 8], strides = [1, 1]} : vector<16x96xf32> to vector<16x8xf32>
    %19 = vector.extract_strided_slice %7 {offsets = [0, 72], sizes = [16, 8], strides = [1, 1]} : vector<16x96xf32> to vector<16x8xf32>
    %20 = vector.extract_strided_slice %7 {offsets = [0, 80], sizes = [16, 8], strides = [1, 1]} : vector<16x96xf32> to vector<16x8xf32>
    %21 = vector.extract_strided_slice %7 {offsets = [0, 88], sizes = [16, 8], strides = [1, 1]} : vector<16x96xf32> to vector<16x8xf32>
    %22 = tpu.concatenate %18, %19, %20, %21 in 0 : vector<16x8xf32>, vector<16x8xf32>, vector<16x8xf32>, vector<16x8xf32> -> vector<64x8xf32>
    %cst_8 = arith.constant dense<0.000000e+00> : vector<64x64xf32>
    %23 = tpu.matmul %12, %17, %cst_8 {dimension_numbers = #tpu.dot_dimension_numbers<[1], [1], [0], [0], [0, 0, 1, 0], [], []>} : vector<64x8xf32>, vector<64x8xf32>, vector<64x64xf32> -> vector<64x64xf32>
    %24 = tpu.iota {dimensions = array<i32: 0>} : vector<64x64xi32>
    %25 = tpu.iota {dimensions = array<i32: 1>} : vector<64x64xi32>
    %26 = arith.xori %24, %25 : vector<64x64xi32>
    %c8_i32 = arith.constant 8 : i32
    %27 = vector.broadcast %c8_i32 : i32 to vector<64x64xi32>
    %28 = arith.cmpi slt, %26, %27 : vector<64x64xi32>
    %cst_9 = arith.constant -1.000000e+30 : f32
    %29 = vector.broadcast %cst_9 : f32 to vector<64x64xf32>
    %30 = arith.select %28, %23, %29 : vector<64x64xi1>, vector<64x64xf32>
    %cst_10 = arith.constant dense<0xFF800000> : vector<64xf32>
    %31 = vector.multi_reduction <maximumf>, %30, %cst_10 [1] : vector<64x64xf32> to vector<64xf32>
    %32 = vector.shape_cast %31 : vector<64xf32> to vector<64x1xf32>
    %33 = vector.broadcast %32 : vector<64x1xf32> to vector<64x64xf32>
    %34 = arith.subf %30, %33 : vector<64x64xf32>
    %35 = math.exp %34 : vector<64x64xf32>
    %cst_11 = arith.constant dense<0.000000e+00> : vector<64xf32>
    %36 = vector.multi_reduction <add>, %35, %cst_11 [1] : vector<64x64xf32> to vector<64xf32>
    %37 = vector.shape_cast %36 : vector<64xf32> to vector<64x1xf32>
    %38 = vector.broadcast %37 : vector<64x1xf32> to vector<64x64xf32>
    %39 = arith.divf %35, %38 : vector<64x64xf32>
    %cst_12 = arith.constant dense<0.000000e+00> : vector<64x8xf32>
    %40 = tpu.matmul %39, %22, %cst_12 {dimension_numbers = #tpu.dot_dimension_numbers<[1], [0], [0], [1], [0, 0, 1, 1], [], []>} : vector<64x64xf32>, vector<64x8xf32>, vector<64x8xf32> -> vector<64x8xf32>
    %41 = vector.extract_strided_slice %40 {offsets = [0, 0], sizes = [16, 8], strides = [1, 1]} : vector<64x8xf32> to vector<16x8xf32>
    %42 = vector.extract_strided_slice %3 {offsets = [0, 0], sizes = [8, 32], strides = [1, 1]} : vector<32x32xf32> to vector<8x32xf32>
    %cst_13 = arith.constant dense<0.000000e+00> : vector<16x32xf32>
    %43 = tpu.matmul %41, %42, %cst_13 {dimension_numbers = #tpu.dot_dimension_numbers<[1], [0], [0], [1], [0, 0, 1, 1], [], []>} : vector<16x8xf32>, vector<8x32xf32>, vector<16x32xf32> -> vector<16x32xf32>
    %44 = vector.extract_strided_slice %40 {offsets = [16, 0], sizes = [16, 8], strides = [1, 1]} : vector<64x8xf32> to vector<16x8xf32>
    %45 = vector.extract_strided_slice %3 {offsets = [8, 0], sizes = [8, 32], strides = [1, 1]} : vector<32x32xf32> to vector<8x32xf32>
    %cst_14 = arith.constant dense<0.000000e+00> : vector<16x32xf32>
    %46 = tpu.matmul %44, %45, %cst_14 {dimension_numbers = #tpu.dot_dimension_numbers<[1], [0], [0], [1], [0, 0, 1, 1], [], []>} : vector<16x8xf32>, vector<8x32xf32>, vector<16x32xf32> -> vector<16x32xf32>
    %47 = arith.addf %43, %46 : vector<16x32xf32>
    %48 = vector.extract_strided_slice %40 {offsets = [32, 0], sizes = [16, 8], strides = [1, 1]} : vector<64x8xf32> to vector<16x8xf32>
    %49 = vector.extract_strided_slice %3 {offsets = [16, 0], sizes = [8, 32], strides = [1, 1]} : vector<32x32xf32> to vector<8x32xf32>
    %cst_15 = arith.constant dense<0.000000e+00> : vector<16x32xf32>
    %50 = tpu.matmul %48, %49, %cst_15 {dimension_numbers = #tpu.dot_dimension_numbers<[1], [0], [0], [1], [0, 0, 1, 1], [], []>} : vector<16x8xf32>, vector<8x32xf32>, vector<16x32xf32> -> vector<16x32xf32>
    %51 = arith.addf %47, %50 : vector<16x32xf32>
    %52 = vector.extract_strided_slice %40 {offsets = [48, 0], sizes = [16, 8], strides = [1, 1]} : vector<64x8xf32> to vector<16x8xf32>
    %53 = vector.extract_strided_slice %3 {offsets = [24, 0], sizes = [8, 32], strides = [1, 1]} : vector<32x32xf32> to vector<8x32xf32>
    %cst_16 = arith.constant dense<0.000000e+00> : vector<16x32xf32>
    %54 = tpu.matmul %52, %53, %cst_16 {dimension_numbers = #tpu.dot_dimension_numbers<[1], [0], [0], [1], [0, 0, 1, 1], [], []>} : vector<16x8xf32>, vector<8x32xf32>, vector<16x32xf32> -> vector<16x32xf32>
    %55 = arith.addf %51, %54 : vector<16x32xf32>
    %56 = vector.broadcast %4 : vector<1x32xf32> to vector<16x32xf32>
    %57 = arith.addf %55, %56 : vector<16x32xf32>
    %c0_17 = arith.constant 0 : index
    %c0_18 = arith.constant 0 : index
    %58 = vector.load %arg3[%c0_17, %c0_18] : memref<16x32xf32, #tpu.memory_space<vmem>>, vector<16x32xf32>
    tpu.vector_store %arg3[%c0_17, %c0_18], %57 {strides = array<i32>} : memref<16x32xf32, #tpu.memory_space<vmem>>, vector<16x32xf32>,
    return
  }
}

</mosaic_0001>

<bundles_post_ra>
// kernel: tpu_custom_call.1
= control target key start
LH: loop header
LB: loop body
LE: loop exit
PB: predicated region body
PF: predicated region fallthrough
CT: control target
= control target key end

     0   :  { %vm31_vm0 = vcmask 261120   ;;  %s1443_s0 = inlined_call_operand.vmem [shape: f32[16,32], index: 0, kind: input, shape index: {}]   ;;  %s1444_s1 = inlined_call_operand.vmem [shape: f32[33,96], index: 1, kind: input, shape index: {}]   ;;  %s1445_s2 = inlined_call_operand.vmem [shape: f32[33,32], index: 2, kind: input, shape index: {}]   ;;  %s1446_s3 = inlined_call_operand.hbm [shape: f32[16,32], index: 3, kind: output, shape index: {}]  }
   0x1   :  { %v17_v0 = vld [vmem:[%s1444_s1] sm:$0xff]  ;;  %v18_v1 = vld [vmem:[%s1444_s1 + $0x8] sm:$0xff]  ;;  %v19_v2 = vld [vmem:[%s1444_s1 + $0x10] sm:$0xff] }
   0x2   :  { %v1083_v3 = vpack.c.bf16 %v18_v1, %v17_v0  ;;  %v20_v4 = vld [vmem:[%s1444_s1 + $0x18] sm:$0xff]  ;;  %v15_v5 = vld [vmem:[%s1443_s0] sm:$0xff] }
   0x3   :  { %v1087_v6 = vpack.c.bf16 %v20_v4, %v19_v2  ;;  %1004 = vmatprep.mubr.msk.f32.mxu0 %vm31_vm0, %v15_v5 }
   0x4   :  { %8 = vsyncpa [#allocation3], 0  ;;  %1084 = vmatprep.subr.bf16.mxu0 %v1083_v3  ;;  %v16_v7 = vld [vmem:[%s1443_s0 + $0x8] sm:$0xff]  ;;  %v910_v8 = vld [vmem:[%s1444_s1 + $0x20] ss:$0 sm:$0xff]  ;;  %vm143_vm1 = vcmask 64512   ;;  %v281_v40 = vlaneseq }
   0x5   :  { %1086 = vmatpush3.bf16.msra.mxu0 %v1083_v3  ;;  %s1249_s26 = smov 112   ;;  %s1250_s27 = smov 120   ;;  %vm1315_vm2 = vmpackc.low %vm143_vm1, %vm143_vm1  ;;  %vm316_vm5 = vcmask 523264  }
   0x6   :  { %1088 = vmatprep.subr.bf16.mxu0 %v1087_v6  ;;  %s1251_s0 = smov 104   ;;  %s1252_s28 = smov 96   ;;  %v282_v41 = vshrl.u32 %v281_v40, 7  ;;  %v291_v43 = vand.u32 127, %v281_v40 }
   0x7   :  { %s1253_s1 = smov 64   ;;  %s1254_s12 = smov [#allocation2]  }
   0x8   :  { %v283_v42 = vadd.s32 8, %v282_v41  ;;  %v292_v45 = vxor.u32 %v291_v43, %v282_v41  ;;  %v284_v46 = vadd.s32 16, %v282_v41  ;;  %v285_v47 = vadd.s32 24, %v282_v41  ;;  %s899_s13 = sshll.u32 %s1254_s12, 4  ;;  %s900_s13 = int_to_ptr.vmem [resolvable:$true] %s899_s13 }
   0x9   :  { %1090 = vmatpush3.bf16.msra.mxu0 %v1087_v6  ;;  %v286_v49 = vadd.s32 32, %v282_v41  ;;  %v287_v54 = vadd.s32 40, %v282_v41  ;;  %v288_v59 = vadd.s32 48, %v282_v41  ;;  %v289_v63 = vadd.s32 56, %v282_v41  ;;  %s1225_s14 = scalar_lea.vmem %s900_s13, 256  ;;  %p1230_p1 = scmp.lt.s32.totalorder %s900_s13, %s900_s13 }
   0xa   :  { %v293_v44 = vxor.u32 %v291_v43, %v283_v42  ;;  %vm300_vm4 = vcmp.lt.s32.totalorder %v292_v45, 8  ;;  %v294_v48 = vxor.u32 %v291_v43, %v284_v46  ;;  %v295_v53 = vxor.u32 %v291_v43, %v285_v47  ;;  %p1226_p0 = scmp.ne.s32.totalorder %s900_s13, %s1225_s14  ;;  %p1231_p2 = scmp.lt.s32.totalorder %s1225_s14, %s1225_s14 }
   0xb   :  { %v296_v58 = vxor.u32 %v291_v43, %v286_v49  ;;  %v297_v62 = vxor.u32 %v291_v43, %v287_v54  ;;  %v298_v2 = vxor.u32 %v291_v43, %v288_v59  ;;  %v299_v6 = vxor.u32 %v291_v43, %v289_v63 }
   0xc   :  { %1005 = vmatmul.mubr.msk.f32.vlgmr.msra.gmra.mrb[0].mxu0 %vm31_vm0, %v16_v7  ;;  %vm301_vm3 = vcmp.lt.s32.totalorder %v293_v44, 8  ;;  %vm302_vm6 = vcmp.lt.s32.totalorder %v294_v48, 8  ;;  %vm303_vm7 = vcmp.lt.s32.totalorder %v295_v53, 8  ;;  %p1232_p3 = por %p1231_p2, %p1230_p1 }
   0xd   :  { %vm304_vm8 = vcmp.lt.s32.totalorder %v296_v58, 8  ;;  %vm305_vm9 = vcmp.lt.s32.totalorder %v297_v62, 8  ;;  %vm306_vm10 = vcmp.lt.s32.totalorder %v298_v2, 8  ;;  %vm307_vm11 = vcmp.lt.s32.totalorder %v299_v6, 8 }
   0xe   :  { %p1233_p4 = pnand %p1232_p3, %p1226_p0 }
  0xdf   :  { %v1006_v9 = vpop.f32.mrb[0].mxu0 }
  0xe0   :  { %v104_v10 = vpop.f32.mrb[1].mxu0  ;;  %v110_v12 = vadd.f32 %v1006_v9, %v910_v8 }
  0xe1   :  { %v105_v11 = vadd.f32 %v910_v8, %v104_v10 }
  0xe3   :  { %119 = vrot.lane.b32.xlu1 %v105_v11, %s1249_s26  ;;  %115 = vrot.lane.b32.xlu0 %v105_v11, %s1250_s27  ;;  %v1301_v13 = vpack.i.bf16 %v110_v12, %v105_v11 }
  0xe4   :  { %1023 = vmatprep.mubr.msk.f32.mxu1 %vm143_vm1, %v105_v11 }
  0xe7   :  { %121 = vrot.lane.b32.xlu1 %v110_v12, %s1249_s26  ;;  %117 = vrot.lane.b32.xlu0 %v110_v12, %s1250_s27 }
  0xeb   :  { %125 = vrot.lane.b32.xlu1 %v110_v12, %s1251_s0  ;;  %123 = vrot.lane.b32.xlu0 %v105_v11, %s1251_s0 }
  0xef   :  { %1154 = vrot.lane.b32.xlu0 %v1301_v13, %s1252_s28 }
 0x155   :  { %v120_v14 = vpop.permute.xlu1 %119  ;;  %v116_v15 = vpop.permute.xlu0 %115 }
 0x159   :  { %v122_v16 = vpop.permute.xlu1 %121  ;;  %v118_v17 = vpop.permute.xlu0 %117 }
 0x15a   :  { %v1304_v18 = vpack.i.bf16 %v122_v16, %v120_v14  ;;  %v1306_v19 = vpack.i.bf16 %v118_v17, %v116_v15 }
 0x15c   :  { %1164 = vrot.lane.b32.xlu0 %v1304_v18, %s1252_s28  ;;  %1159 = vrot.lane.b32.xlu1 %v1306_v19, %s1252_s28 }
 0x15d   :  { %v126_v20 = vpop.permute.xlu1 %125  ;;  %v124_v21 = vpop.permute.xlu0 %123 }
 0x15e   :  { %v1310_v22 = vpack.i.bf16 %v126_v20, %v124_v21 }
 0x160   :  { %1169 = vrot.lane.b32.xlu1 %v1310_v22, %s1252_s28 }
 0x161   :  { %v1155_v23 = vpop.permute.xlu0 %1154 }
 0x162   :  { %v1157_v24 = vunpack.i.h.bf16 %v1155_v23  ;;  %v1156_v25 = vunpack.i.l.bf16 %v1155_v23 }
 0x164   :  { %v1091_v27 = vpack.c.bf16 %v1157_v24, %v1156_v25 }
 0x166   :  { %1093 = vmatprep.subr.msk.bf16.mxu1 %vm1315_vm2, %v1091_v27 }
 0x167   :  { %1096 = vmatpush3.bf16.xpose.msk.msra.mxu1 %vm1315_vm2, %v1091_v27 }
 0x1ce   :  { %v1160_v28 = vpop.permute.xlu1 %1159  ;;  %v1165_v29 = vpop.permute.xlu0 %1164 }
 0x1cf   :  { %v1162_v30 = vunpack.i.h.bf16 %v1160_v28  ;;  %v1161_v31 = vunpack.i.l.bf16 %v1160_v28  ;;  %v1167_v32 = vunpack.i.h.bf16 %v1165_v29  ;;  %v1166_v33 = vunpack.i.l.bf16 %v1165_v29 }
 0x1d1   :  { %v1097_v34 = vpack.c.bf16 %v1162_v30, %v1161_v31  ;;  %v1103_v35 = vpack.c.bf16 %v1167_v32, %v1166_v33 }
 0x1d2   :  { %v1170_v36 = vpop.permute.xlu1 %1169 }
 0x1d3   :  { %1099 = vmatprep.subr.msk.bf16.mxu1 %vm1315_vm2, %v1097_v34  ;;  %v1172_v37 = vunpack.i.h.bf16 %v1170_v36  ;;  %v1171_v38 = vunpack.i.l.bf16 %v1170_v36 }
 0x1d4   :  { %1102 = vmatpush3.bf16.xpose.msk.msra.mxu1 %vm1315_vm2, %v1097_v34 }
 0x1d5   :  { %1105 = vmatprep.subr.msk.bf16.mxu1 %vm1315_vm2, %v1103_v35  ;;  %v1109_v39 = vpack.c.bf16 %v1172_v37, %v1171_v38 }
 0x1dc   :  { %1108 = vmatpush3.bf16.xpose.msk.msra.mxu1 %vm1315_vm2, %v1103_v35 }
 0x1dd   :  { %1111 = vmatprep.subr.msk.bf16.mxu1 %vm1315_vm2, %v1109_v39 }
 0x1e4   :  { %1114 = vmatpush3.bf16.xpose.msk.msra.mxu1 %vm1315_vm2, %v1109_v39 }
 0x1eb   :  { %1024 = vmatmul.mubr.msk.f32.vlgmr.msra.gmra.mrb[0].mxu1 %vm143_vm1, %v110_v12 }
 0x1ec   :  { %1026 = vmatprep.mubr.msk.f32.mxu1 %vm143_vm1, %v116_v15 }
 0x1ef   :  { %1027 = vmatmul.mubr.msk.f32.gmra.mrb[2].mxu1 %vm143_vm1, %v118_v17 }
 0x1f0   :  { %1029 = vmatprep.mubr.msk.f32.mxu1 %vm143_vm1, %v120_v14 }
 0x1f3   :  { %1030 = vmatmul.mubr.msk.f32.gmra.mrb[4].mxu1 %vm143_vm1, %v122_v16 }
 0x1f4   :  { %1032 = vmatprep.mubr.msk.f32.mxu1 %vm143_vm1, %v124_v21 }
 0x1f7   :  { %1033 = vmatmul.mubr.msk.f32.gmra.mrb[6].mxu1 %vm143_vm1, %v126_v20 }
 0x2be   :  { %v1025_v50 = vpop.f32.mrb[0].mxu1 }
 0x2bf   :  { %v309_v51 = vsel %vm301_vm3, %v1025_v50, -1e+30  ;;  %v242_v52 = vpop.f32.mrb[1].mxu1 }
 0x2c0   :  { %v308_v55 = vsel %vm300_vm4, %v242_v52, -1e+30  ;;  %v320_v56 = vsel %vm316_vm5, %v309_v51, -inf }
 0x2c1   :  { %321 = vmax.xlane.f32.xlu1 %v320_v56  ;;  %v317_v57 = vsel %vm316_vm5, %v308_v55, -inf }
 0x2c2   :  { %318 = vmax.xlane.f32.xlu0 %v317_v57  ;;  %v1028_v60 = vpop.f32.mrb[2].mxu1 }
 0x2c3   :  { %v252_v61 = vpop.f32.mrb[3].mxu1  ;;  %v311_v3 = vsel %vm303_vm7, %v1028_v60, -1e+30 }
 0x2c4   :  { %v310_v0 = vsel %vm302_vm6, %v252_v61, -1e+30  ;;  %v326_v8 = vsel %vm316_vm5, %v311_v3, -inf }
 0x2c5   :  { %v323_v1 = vsel %vm316_vm5, %v310_v0, -inf }
 0x2c6   :  { %324 = vmax.xlane.f32.xlu0 %v323_v1  ;;  %v1031_v4 = vpop.f32.mrb[4].mxu1 }
 0x2c7   :  { %v262_v5 = vpop.f32.mrb[5].mxu1  ;;  %v313_v10 = vsel %vm305_vm9, %v1031_v4, -1e+30 }
 0x2c8   :  { %v1345_v7 = vsel %vm304_vm8, %v262_v5, -1e+30  ;;  %v332_v15 = vsel %vm316_vm5, %v313_v10, -inf }
 0x2c9   :  { %v329_v9 = vsel %vm316_vm5, %v1345_v7, -inf }
 0x2ca   :  { %327 = vmax.xlane.f32.xlu0 %v326_v8  ;;  %330 = vmax.xlane.f32.xlu1 %v329_v9  ;;  %v1034_v11 = vpop.f32.mrb[6].mxu1 }
 0x2cb   :  { %v272_v12 = vpop.f32.mrb[7].mxu1  ;;  %v1355_v17 = vsel %vm307_vm11, %v1034_v11, -1e+30 }
 0x2cc   :  { %v1350_v14 = vsel %vm306_vm10, %v272_v12, -1e+30  ;;  %v338_v20 = vsel %vm316_vm5, %v1355_v17, -inf }
 0x2cd   :  { %v335_v16 = vsel %vm316_vm5, %v1350_v14, -inf }
 0x2ce   :  { %333 = vmax.xlane.f32.xlu0 %v332_v15  ;;  %336 = vmax.xlane.f32.xlu1 %v335_v16 }
 0x2d2   :  { %339 = vmax.xlane.f32.xlu0 %v338_v20 }
 0x2df   :  { %1174 = vrot.lane.b32.xlu1 %v1301_v13, %s1253_s1 }
 0x2e8   :  { %1179 = vrot.lane.b32.xlu0 %v1306_v19, %s1253_s1 }
 0x34e   :  { %v322_v21 = vpop.xlane.xlu1 %321 }
 0x34f   :  { %v342_v23 = vsub.f32 %v309_v51, %v322_v21  ;;  %v319_v24 = vpop.xlane.xlu0 %318 }
 0x350   :  { %v341_v25 = vsub.f32 %v308_v55, %v319_v24 }
 0x351   :  { %v351_v26 = vmul.f32 1.442695, %v342_v23 }
 0x352   :  { %v349_v27 = vmul.f32 1.442695, %v341_v25 }
 0x353   :  { %1193 = vpow2.f32 %v351_v26  ;;  %v325_v28 = vpop.xlane.xlu0 %324 }
 0x354   :  { %1195 = vpow2.f32 %v349_v27  ;;  %v343_v29 = vsub.f32 %v310_v0, %v325_v28 }
 0x356   :  { %v353_v30 = vmul.f32 1.442695, %v343_v29 }
 0x357   :  { %v328_v31 = vpop.xlane.xlu0 %327  ;;  %v331_v32 = vpop.xlane.xlu1 %330 }
 0x358   :  { %1197 = vpow2.f32 %v353_v30  ;;  %v344_v33 = vsub.f32 %v311_v3, %v328_v31  ;;  %v345_v56 = vsub.f32 %v1345_v7, %v331_v32 }
 0x35a   :  { %v355_v34 = vmul.f32 1.442695, %v344_v33  ;;  %v357_v57 = vmul.f32 1.442695, %v345_v56 }
 0x35b   :  { %v334_v13 = vpop.xlane.xlu0 %333  ;;  %v337_v35 = vpop.xlane.xlu1 %336 }
 0x35c   :  { %1199 = vpow2.f32 %v355_v34  ;;  %v346_v19 = vsub.f32 %v313_v10, %v334_v13  ;;  %v347_v58 = vsub.f32 %v1350_v14, %v337_v35 }
 0x35d   :  { %v1363_v36 = vpop.eup %1193 }
 0x35e   :  { %v1365_v37 = vpop.eup %1195  ;;  %v359_v38 = vmul.f32 1.442695, %v346_v19  ;;  %v368_v39 = vsel %vm316_vm5, %v1363_v36, 0.0  ;;  %v361_v59 = vmul.f32 1.442695, %v347_v58 }
 0x35f   :  { %369 = vadd.xlane.f32.xlu0 %v368_v39  ;;  %v340_v40 = vpop.xlane.xlu0 %339  ;;  %v1175_v41 = vpop.permute.xlu1 %1174  ;;  %v365_v42 = vsel %vm316_vm5, %v1365_v37, 0.0 }
 0x360   :  { %1201 = vpow2.f32 %v359_v38  ;;  %v1177_v43 = vunpack.i.h.bf16 %v1175_v41  ;;  %v1176_v44 = vunpack.i.l.bf16 %v1175_v41  ;;  %366 = vadd.xlane.f32.xlu1 %v365_v42  ;;  %v348_v60 = vsub.f32 %v1355_v17, %v340_v40  ;;  %v24_v42 = vld [vmem:[%s1445_s2 + $0x10] sm:$0xff] }
 0x361   :  { %1203 = vpow2.f32 %v357_v57 }
 0x362   :  { %v1371_v45 = vpop.eup %1197  ;;  %v1115_v46 = vpack.c.bf16 %v1177_v43, %v1176_v44  ;;  %1205 = vpow2.f32 %v361_v59  ;;  %v363_v61 = vmul.f32 1.442695, %v348_v60  ;;  %v25_v43 = vld [vmem:[%s1445_s2 + $0x18] sm:$0xff] }
 0x363   :  { %v1180_v47 = vpop.permute.xlu0 %1179  ;;  %v371_v48 = vsel %vm316_vm5, %v1371_v45, 0.0 }
 0x364   :  { %v1182_v49 = vunpack.i.h.bf16 %v1180_v47  ;;  %v1181_v50 = vunpack.i.l.bf16 %v1180_v47  ;;  %372 = vadd.xlane.f32.xlu1 %v371_v48  ;;  %1116 = vmatprep.subr.bf16.mxu0 %v1115_v46  ;;  %1207 = vpow2.f32 %v363_v61  ;;  %v945_v48 = vld [vmem:[%s1445_s2 + $0x20] ss:$0 sm:$0xff] }
 0x365   :  { %1131 = vmatprep.subr.bf16.mxu1 %v1115_v46  ;;  %1118 = vmatpush3.bf16.msra.mxu0 %v1115_v46 }
 0x366   :  { %v1375_v51 = vpop.eup %1199  ;;  %v1119_v52 = vpack.c.bf16 %v1182_v49, %v1181_v50  ;;  %1135 = vmatpush3.bf16.msra.mxu1 %v1115_v46 }
 0x367   :  { %v374_v53 = vsel %vm316_vm5, %v1375_v51, 0.0 }
 0x368   :  { %375 = vadd.xlane.f32.xlu0 %v374_v53  ;;  %1120 = vmatprep.subr.bf16.mxu0 %v1119_v52 }
 0x369   :  { %1132 = vmatprep.subr.bf16.mxu1 %v1119_v52  ;;  %1122 = vmatpush3.bf16.msra.mxu0 %v1119_v52 }
 0x36a   :  { %v1379_v54 = vpop.eup %1201  ;;  %1136 = vmatpush3.bf16.msra.mxu1 %v1119_v52 }
 0x36b   :  { %v380_v55 = vsel %vm316_vm5, %v1379_v54, 0.0  ;;  %v1204_v62 = vpop.eup %1203 }
 0x36c   :  { %381 = vadd.xlane.f32.xlu0 %v380_v55  ;;  %v377_v63 = vsel %vm316_vm5, %v1204_v62, 0.0  ;;  %v1206_v0 = vpop.eup %1205 }
 0x375   :  { %1184 = vrot.lane.b32.xlu1 %v1304_v18, %s1253_s1  ;;  %v383_v18 = vsel %vm316_vm5, %v1206_v0, 0.0 }
 0x382   :  { %1189 = vrot.lane.b32.xlu0 %v1310_v22, %s1253_s1  ;;  %v1208_v22 = vpop.eup %1207 }
 0x383   :  { %v386_v1 = vsel %vm316_vm5, %v1208_v22, 0.0 }
 0x399   :  { %378 = vadd.xlane.f32.xlu1 %v377_v63 }
 0x39d   :  { %384 = vadd.xlane.f32.xlu1 %v383_v18 }
 0x3a1   :  { %387 = vadd.xlane.f32.xlu1 %v386_v1 }
 0x3ec   :  { %v370_v3 = vpop.xlane.xlu0 %369 }
 0x3ed   :  { %v367_v2 = vpop.xlane.xlu1 %366 }
 0x3ee   :  { %1209 = vrcp.f32 %v367_v2 }
 0x3ef   :  { %1211 = vrcp.f32 %v370_v3 }
 0x3f1   :  { %v373_v4 = vpop.xlane.xlu1 %372 }
 0x3f2   :  { %1213 = vrcp.f32 %v373_v4 }
 0x3f5   :  { %v376_v5 = vpop.xlane.xlu0 %375  ;;  %v1185_v6 = vpop.permute.xlu1 %1184 }
 0x3f6   :  { %v1187_v7 = vunpack.i.h.bf16 %v1185_v6  ;;  %v1186_v8 = vunpack.i.l.bf16 %v1185_v6  ;;  %1215 = vrcp.f32 %v376_v5 }
 0x3f8   :  { %v1210_v9 = vpop.eup %1209  ;;  %v1123_v10 = vpack.c.bf16 %v1187_v7, %v1186_v8 }
 0x3f9   :  { %v382_v11 = vpop.xlane.xlu0 %381  ;;  %v390_v12 = vmul.f32 %v1210_v9, %v1365_v37  ;;  %v1212_v20 = vpop.eup %1211  ;;  %v22_v37 = vld [vmem:[%s1445_s2] sm:$0xff] }
 0x3fa   :  { %1124 = vmatprep.subr.bf16.mxu0 %v1123_v10  ;;  %1133 = vmatprep.subr.bf16.mxu1 %v1123_v10  ;;  %v392_v23 = vmul.f32 %v1212_v20, %v1363_v36  ;;  %1217 = vrcp.f32 %v382_v11  ;;  %v23_v36 = vld [vmem:[%s1445_s2 + $0x8] sm:$0xff] }
 0x3fb   :  { %1126 = vmatpush3.bf16.msra.mxu0 %v1123_v10  ;;  %1137 = vmatpush3.bf16.msra.mxu1 %v1123_v10 }
 0x3fc   :  { %1051 = vmatprep.mubr.msk.f32.mxu0 %vm316_vm5, %v390_v12  ;;  %v1214_v21 = vpop.eup %1213 }
 0x3fd   :  { %v1190_v14 = vpop.permute.xlu0 %1189  ;;  %v394_v25 = vmul.f32 %v1214_v21, %v1371_v45 }
 0x3fe   :  { %v1192_v15 = vunpack.i.h.bf16 %v1190_v14  ;;  %v1191_v16 = vunpack.i.l.bf16 %v1190_v14 }
 0x400   :  { %v1127_v17 = vpack.c.bf16 %v1192_v15, %v1191_v16  ;;  %v1216_v24 = vpop.eup %1215 }
 0x401   :  { %v396_v26 = vmul.f32 %v1216_v24, %v1375_v51 }
 0x402   :  { %1128 = vmatprep.subr.bf16.mxu0 %v1127_v17  ;;  %1134 = vmatprep.subr.bf16.mxu1 %v1127_v17 }
 0x403   :  { %1130 = vmatpush3.bf16.msra.mxu0 %v1127_v17  ;;  %1138 = vmatpush3.bf16.msra.mxu1 %v1127_v17 }
 0x404   :  { %v1218_v30 = vpop.eup %1217  ;;  %1063 = vmatprep.subr.mxu0 %v23_v36 }
 0x405   :  { %v400_v33 = vmul.f32 %v1218_v30, %v1379_v54 }
 0x406   :  { %1052 = vmatmul.mubr.msk.f32.vlgmr.msra.gmra.mrb[2].mxu0 %vm316_vm5, %v392_v23 }
 0x407   :  { %1054 = vmatprep.mubr.msk.f32.mxu0 %vm316_vm5, %v394_v25  ;;  %1064 = vmatpush3.msra.mxu0 %v23_v36 }
 0x408   :  { %1068 = vmatprep.subr.mxu0 %v22_v37 }
 0x40a   :  { %1055 = vmatmul.mubr.msk.f32.gmra.mrb[4].mxu0 %vm316_vm5, %v396_v26 }
 0x426   :  { %v379_v27 = vpop.xlane.xlu1 %378 }
 0x427   :  { %1219 = vrcp.f32 %v379_v27 }
 0x42a   :  { %v385_v28 = vpop.xlane.xlu1 %384 }
 0x42b   :  { %1221 = vrcp.f32 %v385_v28 }
 0x42e   :  { %v388_v29 = vpop.xlane.xlu1 %387 }
 0x42f   :  { %1223 = vrcp.f32 %v388_v29 }
 0x431   :  { %v1220_v31 = vpop.eup %1219 }
 0x432   :  { %v398_v32 = vmul.f32 %v1220_v31, %v1204_v62 }
 0x434   :  { %1057 = vmatprep.mubr.msk.f32.mxu0 %vm316_vm5, %v398_v32 }
 0x435   :  { %v1222_v34 = vpop.eup %1221  ;;  %1058 = vmatmul.mubr.msk.f32.gmra.mrb[6].mxu0 %vm316_vm5, %v400_v33 }
 0x436   :  { %v402_v13 = vmul.f32 %v1222_v34, %v1206_v0 }
 0x438   :  { %1060 = vmatprep.mubr.msk.f32.mxu1 %vm316_vm5, %v402_v13 }
 0x439   :  { %v1224_v35 = vpop.eup %1223 }
 0x43a   :  { %v404_v19 = vmul.f32 %v1224_v35, %v1208_v22 }
 0x43c   :  { %1061 = vmatmul.mubr.msk.f32.vlgmr.msra.gmra.mrb[8].mxu1 %vm316_vm5, %v404_v19 }
 0x4d9   :  { %v1053_v38 = vpop.f32.mrb[2].mxu0 }
 0x4da   :  { %v519_v39 = vpop.f32.mrb[3].mxu0 }
 0x4dd   :  { %v1056_v40 = vpop.f32.mrb[4].mxu0 }
 0x4de   :  { %v529_v41 = vpop.f32.mrb[5].mxu0 }
 0x4df   :  { %1065 = vmatprep.mubr.msk.f32.mxu0 %vm143_vm1, %v529_v41 }
 0x4e0   :  { %1066 = vmatmul.mubr.msk.f32.vlgmr.msra.gmra.mrb[8].mxu0 %vm143_vm1, %v1056_v40 }
 0x4e1   :  { %1070 = vmatprep.mubr.msk.f32.mxu0 %vm143_vm1, %v519_v39  ;;  %1069 = vmatpush3.msra.mxu0 %v22_v37 }
 0x4e2   :  { %1073 = vmatprep.subr.mxu0 %v24_v42 }
 0x4e8   :  { %1071 = vmatmul.mubr.msk.f32.vlgmr.msra.gmra.mrb[8].mxu0 %vm143_vm1, %v1053_v38 }
 0x4e9   :  { %1074 = vmatpush3.msra.mxu0 %v24_v42 }
 0x4ea   :  { %1078 = vmatprep.subr.mxu0 %v25_v43 }
 0x508   :  { %v1059_v44 = vpop.f32.mrb[6].mxu0 }
 0x509   :  { %v539_v45 = vpop.f32.mrb[7].mxu0 }
 0x50a   :  { %1075 = vmatprep.mubr.msk.f32.mxu0 %vm143_vm1, %v539_v45 }
 0x50b   :  { %1076 = vmatmul.mubr.msk.f32.vlgmr.msra.gmra.mrb[8].mxu0 %vm143_vm1, %v1059_v44 }
 0x50c   :  { %1079 = vmatpush3.msra.mxu0 %v25_v43 }
 0x50f   :  { %v1062_v46 = vpop.f32.mrb[8].mxu1 }
 0x510   :  { %v549_v47 = vpop.f32.mrb[9].mxu1 }
 0x511   :  { %1080 = vmatprep.mubr.msk.f32.mxu0 %vm143_vm1, %v549_v47 }
 0x513   :  { %1081 = vmatmul.mubr.msk.f32.vlgmr.msra.gmra.mrb[8].mxu0 %vm143_vm1, %v1062_v46 }
 0x5e6   :  { %v1082_v49 = vpop.f32.mrb[8].mxu0 }
 0x5e7   :  { %v891_v50 = vadd.f32 %v1082_v49, %v945_v48  ;;  %v875_v51 = vpop.f32.mrb[9].mxu0 }
 0x5e8   :  { %v890_v52 = vadd.f32 %v945_v48, %v875_v51 }
 0x5e9   :  { %893 = vst.msk [vmem:[#allocation2 + $0x8] sm:$0xff] %vm31_vm0, %v891_v50 }
 0x5ea   :  { %892 = vst.msk [vmem:[#allocation2] sm:$0xff] %vm31_vm0, %v890_v52 }
 0x5eb   :  { %1236 = shalt.err (!%p1233_p4)
}
 0x5ec   :  { %s1237_s16 = scalar_lea.hbm %s1446_s3, 256 }
 0x5ed   :  { %p1238_p5 = scmp.ne.s32.totalorder %s1446_s3, %s1237_s16  ;;  %p1241_p6 = scmp.lt.u32.totalorder %s1237_s16, %s1446_s3 }
 0x5ef   :  { %p1243_p7 = pnand %p1241_p6, %p1238_p5 }
 0x5f1   :  { %1246 = shalt.err (!%p1243_p7)
}
 0x5f2   :  { %s1255_s21 = smov 128   ;;  %s1256_s22 = smov 8  }
 0x5f3   :  { %905 = dma.vmem_to_hbm [thread:$0]  %s900_s13, 256, %s1446_s3, [#allocation3], %s1255_s21, %s1255_s21, %s1256_s22  }
 0x5f4   :  { %1247 = dma.done.wait [#allocation3], 256  }
 0x5f5   :  { %1248 = vsyncadd [#allocation3], 4294967040 }
 0x5f6   :  { %909 = vsyncpa [#allocation3], 1 }

</bundles_post_ra>
